<compile_context>
chip_gen: v6e
topology: v6e:2x2x1
jax: 0.10.0
libtpu: 0.0.40
codegen_flags: <defaults>
</compile_context>

<pallas_src>
import functools

import jax
import jax.numpy as jnp
from jax.experimental import pallas as pl
from jax.experimental.pallas import tpu as pltpu


# ----------------------------------------------------------------------------
# Pallas kernel: K-tiled (Cout, K) @ (K, M) with f32 accumulator,
# bias + optional LeakyReLU(0.2) epilogue, lane-dense (Cout, tm) output.
# ----------------------------------------------------------------------------
def _gemm_bias_act_kernel(w_ref, p_ref, b_ref, o_ref, acc_ref, *, apply_lrelu):
    k = pl.program_id(1)

    @pl.when(k == 0)
    def _():
        acc_ref[...] = jnp.zeros_like(acc_ref)

    acc_ref[...] += jax.lax.dot_general(
        w_ref[...], p_ref[...],
        dimension_numbers=(((1,), (0,)), ((), ())),
        preferred_element_type=jnp.float32)          # (Cout, tm) f32

    @pl.when(k == pl.num_programs(1) - 1)
    def _():
        acc = acc_ref[...] + b_ref[...]               # (Cout, tm) + (Cout, 1)
        if apply_lrelu:
            acc = jnp.maximum(acc, 0.2 * acc)         # LeakyReLU(0.2)
        o_ref[...] = acc.astype(o_ref.dtype)


def _round_up(x, m):
    return (x + m - 1) // m * m


def _pick_tm(Mp):
    """M-tile <= 2048, preferring >= 4 grid steps (2 per TC on v7x)."""
    for tm in (2048, 1024, 512):
        if Mp % tm == 0 and Mp // tm >= 4:
            return tm
    for tm in (2048, 1024, 512):
        if Mp % tm == 0 and Mp // tm >= 2:
            return tm
    return 512  # Mp is always a multiple of 512


def _pick_tk(K):
    """Tile the reduction only when K is big enough to stress VMEM."""
    if K > 1024:
        for tk in (512, 256, 128):
            if K % tk == 0:
                return tk
    return K


def _gemm_fallback(w_ok, patches_km, bias, apply_lrelu, out_dtype):
    out = jnp.dot(w_ok, patches_km, preferred_element_type=jnp.float32)
    out = out + bias[:, None]
    if apply_lrelu:
        out = jnp.maximum(out, 0.2 * out)
    return out.astype(out_dtype)


def gemm_bias_act(w_ok, patches_km, bias, apply_lrelu, out_dtype):
    """w_ok: (Cout, K) bf16, patches_km: (K, M) bf16, bias: (Cout,) f32."""
    Cout, K = w_ok.shape
    M = patches_km.shape[1]

    if M < 512:
        # Tail layers: dispatch + pipeline overhead exceeds the few KFLOP of
        # work; a plain dot that XLA fuses is cheaper.
        return _gemm_fallback(w_ok, patches_km, bias, apply_lrelu, out_dtype)

    Mp = _round_up(M, 512)
    if Mp != M:
        patches_km = jnp.pad(patches_km, ((0, 0), (0, Mp - M)))

    tm = _pick_tm(Mp)
    tk = _pick_tk(K)
    grid = (Mp // tm, K // tk)
    bias2d = bias.reshape(Cout, 1).astype(jnp.float32)

    out_bytes = jnp.dtype(out_dtype).itemsize
    vmem_need = (2 * Cout * tk * 2        # weight tile, double-buffered, bf16
                 + 2 * tk * tm * 2        # patch tile, double-buffered, bf16
                 + 2 * Cout * tm * out_bytes
                 + 2 * Cout * 4           # bias
                 + Cout * tm * 4)         # f32 accumulator scratch
    vmem_limit = int(min(max(2 * vmem_need, 32 << 20), 100 << 20))

    cost = pl.CostEstimate(
        flops=2 * Mp * K * Cout,
        transcendentals=0,
        bytes_accessed=K * Mp * 2 + Cout * K * 2 + Cout * 4
                       + Cout * Mp * out_bytes)

    kernel = functools.partial(_gemm_bias_act_kernel, apply_lrelu=apply_lrelu)
    out = pl.pallas_call(
        kernel,
        out_shape=jax.ShapeDtypeStruct((Cout, Mp), out_dtype),
        grid_spec=pltpu.PrefetchScalarGridSpec(
            num_scalar_prefetch=0,
            grid=grid,
            in_specs=[
                pl.BlockSpec((Cout, tk), lambda i, k: (0, k)),   # weight
                pl.BlockSpec((tk, tm), lambda i, k: (k, i)),     # patch tile
                pl.BlockSpec((Cout, 1), lambda i, k: (0, 0)),    # bias
            ],
            out_specs=pl.BlockSpec((Cout, tm), lambda i, k: (0, i)),
            scratch_shapes=[pltpu.VMEM((Cout, tm), jnp.float32)],
        ),
        compiler_params=pltpu.CompilerParams(
            dimension_semantics=("parallel", "arbitrary"),
            vmem_limit_bytes=vmem_limit),
        cost_estimate=cost,
    )(w_ok, patches_km, bias2d)

    if Mp != M:
        out = out[:, :M]
    return out


# ----------------------------------------------------------------------------
# Plain-JAX glue: transpose-free im2col on CNHW (bf16), spectral normalization
# ----------------------------------------------------------------------------
def im2col_cnhw(x, k, stride, pad):
    """x: (C, N, H, W) -> patches (k*k*C, N*Ho*Wo); K ordered (kh, kw, C)."""
    C, N, H, W = x.shape
    xp = jnp.pad(x, ((0, 0), (0, 0), (pad, pad), (pad, pad)))
    Hp, Wp = H + 2 * pad, W + 2 * pad
    Ho = (Hp - k) // stride + 1
    Wo = (Wp - k) // stride + 1
    cols = []
    for kh in range(k):
        for kw in range(k):
            cols.append(
                xp[:, :, kh:kh + stride * Ho:stride, kw:kw + stride * Wo:stride]
            )
    patches = jnp.stack(cols, axis=0)                 # (k*k, C, N, Ho, Wo)
    return patches.reshape(k * k * C, N * Ho * Wo), Ho, Wo


def spectral_normalize(w, u, n_iter=1, eps=1e-12):
    """PyTorch-style spectral norm: W / sigma, one power iteration (f32)."""
    cout = w.shape[0]
    wm = w.reshape(cout, -1)
    v = None
    for _ in range(n_iter):
        v = wm.T @ u
        v = v / jnp.maximum(jnp.linalg.norm(v), eps)
        u = wm @ v
        u = u / jnp.maximum(jnp.linalg.norm(u), eps)
    sigma = u @ (wm @ v)
    return w / sigma


def conv_sn_layer(x_cnhw, w, b, u, stride, pad, apply_lrelu, out_dtype):
    """Spectral-normalized Conv2d on bf16 CNHW activations; returns CNHW."""
    w_sn = spectral_normalize(w, u)                          # f32 SN math
    Cout, Cin, kh, kw = w_sn.shape
    patches, Ho, Wo = im2col_cnhw(x_cnhw, kh, stride, pad)   # (K, M) bf16
    # Flatten weight with reduction axis ordered (kh, kw, Cin) to match patches.
    w_ok = w_sn.transpose(0, 2, 3, 1).reshape(Cout, kh * kw * Cin)
    w_ok = w_ok.astype(jnp.bfloat16)
    out = gemm_bias_act(w_ok, patches, b, apply_lrelu, out_dtype)  # (Cout, M)
    N = x_cnhw.shape[1]
    return out.reshape(Cout, N, Ho, Wo)                      # stays CNHW


# ----------------------------------------------------------------------------
# CriticSN forward: 6 spectral-norm conv layers, LeakyReLU(0.2) between
# ----------------------------------------------------------------------------
def make_critic_params(key, channels_img, features_c):
    # (Cin, Cout, stride, pad) matching the PyTorch nn.Sequential
    cfg = (
        (channels_img,     features_c,      2, 1),
        (features_c,       features_c * 2,  2, 1),
        (features_c * 2,   features_c * 4,  2, 1),
        (features_c * 4,   features_c * 8,  2, 1),
        (features_c * 8,   features_c * 16, 2, 1),
        (features_c * 16,  1,               1, 0),
    )
    params, layer_cfg = [], []
    for (cin, cout, stride, pad) in cfg:
        key, kw_, kb_, ku_ = jax.random.split(key, 4)
        fan_in = cin * 4 * 4
        bound = 1.0 / jnp.sqrt(fan_in)
        w = jax.random.uniform(kw_, (cout, cin, 4, 4), jnp.float32, -bound, bound)
        b = jax.random.uniform(kb_, (cout,), jnp.float32, -bound, bound)
        u = jax.random.normal(ku_, (cout,), jnp.float32)
        u = u / (jnp.linalg.norm(u) + 1e-12)
        params.append(dict(w=w, b=b, u=u))
        layer_cfg.append((stride, pad))
    return params, tuple(layer_cfg)


@functools.partial(jax.jit, static_argnums=(2,))
def critic_sn_forward(params, x_nchw, layer_cfg):
    # One transpose at entry (NCHW -> CNHW) and one at exit; activations stay
    # bf16 between layers (MXU inputs bf16, f32 accumulate in the kernel).
    x = jnp.transpose(x_nchw, (1, 0, 2, 3)).astype(jnp.bfloat16)
    n_layers = len(layer_cfg)
    for i, ((stride, pad), p) in enumerate(zip(layer_cfg, params)):
        apply_lrelu = i < n_layers - 1           # last conv has no activation
        out_dtype = jnp.bfloat16 if apply_lrelu else jnp.float32
        x = conv_sn_layer(x, p["w"], p["b"], p["u"], stride, pad,
                          apply_lrelu, out_dtype)
    return jnp.transpose(x, (1, 0, 2, 3)).astype(jnp.float32)   # (N, 1, 1, 1)


if __name__ == "__main__":
    key = jax.random.PRNGKey(0)
    k_params, k_x = jax.random.split(key)

    channels_img = 3
    features_c = 4
    batch = 2
    spatial = 128  # architecture requires 128 -> 64 -> 32 -> 16 -> 8 -> 4 -> 1

    params, layer_cfg = make_critic_params(k_params, channels_img, features_c)
    x = jax.random.normal(k_x, (batch, channels_img, spatial, spatial),
                          jnp.float32)

    out = critic_sn_forward(params, x, layer_cfg)
    out = jax.block_until_ready(out)

    assert out.shape == (batch, 1, 1, 1), out.shape
    assert out.dtype == jnp.float32
    print("KERNEL_OK")
</pallas_src>

<mosaic_0001>
module attributes {stable_mosaic.version = 11 : i64} {
  func.func @_gemm_bias_act_kernel(%arg0: i32, %arg1: i32, %arg2: memref<4x48xbf16, #tpu.memory_space<vmem>>, %arg3: memref<48x2048xbf16, #tpu.memory_space<vmem>>, %arg4: memref<4x1xf32, #tpu.memory_space<vmem>>, %arg5: memref<4x2048xbf16, #tpu.memory_space<vmem>>, %arg6: memref<4x2048xf32, #tpu.memory_space<vmem>>) attributes {dimension_semantics = [#tpu.dimension_semantics<parallel>, #tpu.dimension_semantics<arbitrary>], iteration_bounds = array<i64: 4, 1>, scalar_prefetch = 0 : i64, scratch_operands = 1 : i64, tpu.core_type = #tpu.core_type<tc>, window_params = [{transform_indices = @transform_0, window_bounds = array<i64: 4, 48>}, {transform_indices = @transform_1, window_bounds = array<i64: 48, 2048>}, {pipeline_mode = #tpu.pipeline_mode<synchronous>, transform_indices = @transform_2, window_bounds = array<i64: 4, 1>}, {transform_indices = @transform_3, window_bounds = array<i64: 4, 2048>}]} {
    %c0_i32 = arith.constant 0 : i32
    %0 = arith.cmpi eq, %arg1, %c0_i32 : i32
    %1 = arith.extui %0 : i1 to i32
    %c0_i32_0 = arith.constant 0 : i32
    %2 = arith.cmpi ne, %1, %c0_i32_0 : i32
    scf.if %2 {
      %cst_10 = arith.constant 0.000000e+00 : f32
      %12 = vector.broadcast %cst_10 : f32 to vector<4x2048xf32>
      %c0_11 = arith.constant 0 : index
      %c0_12 = arith.constant 0 : index
      %13 = vector.load %arg6[%c0_11, %c0_12] : memref<4x2048xf32, #tpu.memory_space<vmem>>, vector<4x2048xf32>
      tpu.vector_store %arg6[%c0_11, %c0_12], %12 {strides = array<i32>} : memref<4x2048xf32, #tpu.memory_space<vmem>>, vector<4x2048xf32>,
    } else {
    }
    %c0 = arith.constant 0 : index
    %c0_1 = arith.constant 0 : index
    %3 = vector.load %arg6[%c0, %c0_1] : memref<4x2048xf32, #tpu.memory_space<vmem>>, vector<4x2048xf32>
    %c0_2 = arith.constant 0 : index
    %c0_3 = arith.constant 0 : index
    %4 = vector.load %arg2[%c0_2, %c0_3] : memref<4x48xbf16, #tpu.memory_space<vmem>>, vector<4x48xbf16>
    %c0_4 = arith.constant 0 : index
    %c0_5 = arith.constant 0 : index
    %5 = vector.load %arg3[%c0_4, %c0_5] : memref<48x2048xbf16, #tpu.memory_space<vmem>>, vector<48x2048xbf16>
    %cst = arith.constant dense<0.000000e+00> : vector<4x2048xf32>
    %6 = tpu.matmul %4, %5, %cst {dimension_numbers = #tpu.dot_dimension_numbers<[1], [0], [0], [1], [0, 0, 1, 1], [], []>} : vector<4x48xbf16>, vector<48x2048xbf16>, vector<4x2048xf32> -> vector<4x2048xf32>
    %7 = arith.addf %3, %6 : vector<4x2048xf32>
    %c0_6 = arith.constant 0 : index
    %c0_7 = arith.constant 0 : index
    %8 = vector.load %arg6[%c0_6, %c0_7] : memref<4x2048xf32, #tpu.memory_space<vmem>>, vector<4x2048xf32>
    tpu.vector_store %arg6[%c0_6, %c0_7], %7 {strides = array<i32>} : memref<4x2048xf32, #tpu.memory_space<vmem>>, vector<4x2048xf32>,
    %c0_i32_8 = arith.constant 0 : i32
    %9 = arith.cmpi eq, %arg1, %c0_i32_8 : i32
    %10 = arith.extui %9 : i1 to i32
    %c0_i32_9 = arith.constant 0 : i32
    %11 = arith.cmpi ne, %10, %c0_i32_9 : i32
    scf.if %11 {
      %c0_10 = arith.constant 0 : index
      %c0_11 = arith.constant 0 : index
      %12 = vector.load %arg6[%c0_10, %c0_11] : memref<4x2048xf32, #tpu.memory_space<vmem>>, vector<4x2048xf32>
      %c0_12 = arith.constant 0 : index
      %c0_13 = arith.constant 0 : index
      %13 = vector.load %arg4[%c0_12, %c0_13] : memref<4x1xf32, #tpu.memory_space<vmem>>, vector<4x1xf32>
      %14 = vector.broadcast %13 : vector<4x1xf32> to vector<4x2048xf32>
      %15 = arith.addf %12, %14 : vector<4x2048xf32>
      %cst_14 = arith.constant 2.000000e-01 : f32
      %16 = vector.broadcast %cst_14 : f32 to vector<4x2048xf32>
      %17 = arith.mulf %16, %15 : vector<4x2048xf32>
      %18 = arith.maximumf %15, %17 : vector<4x2048xf32>
      %19 = arith.truncf %18 : vector<4x2048xf32> to vector<4x2048xbf16>
      %c0_15 = arith.constant 0 : index
      %c0_16 = arith.constant 0 : index
      %20 = vector.load %arg5[%c0_15, %c0_16] : memref<4x2048xbf16, #tpu.memory_space<vmem>>, vector<4x2048xbf16>
      tpu.vector_store %arg5[%c0_15, %c0_16], %19 {strides = array<i32>} : memref<4x2048xbf16, #tpu.memory_space<vmem>>, vector<4x2048xbf16>,
    } else {
    }
    return
  }
  func.func @transform_0(%arg0: i32, %arg1: i32) -> (i32, i32) {
    %c0_i32 = arith.constant 0 : i32
    %c0_i32_0 = arith.constant 0 : i32
    return %c0_i32, %arg1 : i32, i32
  }
  func.func @transform_1(%arg0: i32, %arg1: i32) -> (i32, i32) {
    %c0_i32 = arith.constant 0 : i32
    return %arg1, %arg0 : i32, i32
  }
  func.func @transform_2(%arg0: i32, %arg1: i32) -> (i32, i32) {
    %c0_i32 = arith.constant 0 : i32
    %c0_i32_0 = arith.constant 0 : i32
    %c0_i32_1 = arith.constant 0 : i32
    return %c0_i32, %c0_i32_0 : i32, i32
  }
  func.func @transform_3(%arg0: i32, %arg1: i32) -> (i32, i32) {
    %c0_i32 = arith.constant 0 : i32
    %c0_i32_0 = arith.constant 0 : i32
    return %c0_i32, %arg0 : i32, i32
  }
}

module attributes {stable_mosaic.version = 11 : i64} {
  func.func @_gemm_bias_act_kernel(%arg0: i32, %arg1: i32, %arg2: memref<8x64xbf16, #tpu.memory_space<vmem>>, %arg3: memref<64x512xbf16, #tpu.memory_space<vmem>>, %arg4: memref<8x1xf32, #tpu.memory_space<vmem>>, %arg5: memref<8x512xbf16, #tpu.memory_space<vmem>>, %arg6: memref<8x512xf32, #tpu.memory_space<vmem>>) attributes {dimension_semantics = [#tpu.dimension_semantics<parallel>, #tpu.dimension_semantics<arbitrary>], iteration_bounds = array<i64: 4, 1>, scalar_prefetch = 0 : i64, scratch_operands = 1 : i64, tpu.core_type = #tpu.core_type<tc>, window_params = [{transform_indices = @transform_0, window_bounds = array<i64: 8, 64>}, {transform_indices = @transform_1, window_bounds = array<i64: 64, 512>}, {pipeline_mode = #tpu.pipeline_mode<synchronous>, transform_indices = @transform_2, window_bounds = array<i64: 8, 1>}, {transform_indices = @transform_3, window_bounds = array<i64: 8, 512>}]} {
    %c0_i32 = arith.constant 0 : i32
    %0 = arith.cmpi eq, %arg1, %c0_i32 : i32
    %1 = arith.extui %0 : i1 to i32
    %c0_i32_0 = arith.constant 0 : i32
    %2 = arith.cmpi ne, %1, %c0_i32_0 : i32
    scf.if %2 {
      %cst_10 = arith.constant 0.000000e+00 : f32
      %12 = vector.broadcast %cst_10 : f32 to vector<8x512xf32>
      %c0_11 = arith.constant 0 : index
      %c0_12 = arith.constant 0 : index
      %13 = vector.load %arg6[%c0_11, %c0_12] : memref<8x512xf32, #tpu.memory_space<vmem>>, vector<8x512xf32>
      tpu.vector_store %arg6[%c0_11, %c0_12], %12 {strides = array<i32>} : memref<8x512xf32, #tpu.memory_space<vmem>>, vector<8x512xf32>,
    } else {
    }
    %c0 = arith.constant 0 : index
    %c0_1 = arith.constant 0 : index
    %3 = vector.load %arg6[%c0, %c0_1] : memref<8x512xf32, #tpu.memory_space<vmem>>, vector<8x512xf32>
    %c0_2 = arith.constant 0 : index
    %c0_3 = arith.constant 0 : index
    %4 = vector.load %arg2[%c0_2, %c0_3] : memref<8x64xbf16, #tpu.memory_space<vmem>>, vector<8x64xbf16>
    %c0_4 = arith.constant 0 : index
    %c0_5 = arith.constant 0 : index
    %5 = vector.load %arg3[%c0_4, %c0_5] : memref<64x512xbf16, #tpu.memory_space<vmem>>, vector<64x512xbf16>
    %cst = arith.constant dense<0.000000e+00> : vector<8x512xf32>
    %6 = tpu.matmul %4, %5, %cst {dimension_numbers = #tpu.dot_dimension_numbers<[1], [0], [0], [1], [0, 0, 1, 1], [], []>} : vector<8x64xbf16>, vector<64x512xbf16>, vector<8x512xf32> -> vector<8x512xf32>
    %7 = arith.addf %3, %6 : vector<8x512xf32>
    %c0_6 = arith.constant 0 : index
    %c0_7 = arith.constant 0 : index
    %8 = vector.load %arg6[%c0_6, %c0_7] : memref<8x512xf32, #tpu.memory_space<vmem>>, vector<8x512xf32>
    tpu.vector_store %arg6[%c0_6, %c0_7], %7 {strides = array<i32>} : memref<8x512xf32, #tpu.memory_space<vmem>>, vector<8x512xf32>,
    %c0_i32_8 = arith.constant 0 : i32
    %9 = arith.cmpi eq, %arg1, %c0_i32_8 : i32
    %10 = arith.extui %9 : i1 to i32
    %c0_i32_9 = arith.constant 0 : i32
    %11 = arith.cmpi ne, %10, %c0_i32_9 : i32
    scf.if %11 {
      %c0_10 = arith.constant 0 : index
      %c0_11 = arith.constant 0 : index
      %12 = vector.load %arg6[%c0_10, %c0_11] : memref<8x512xf32, #tpu.memory_space<vmem>>, vector<8x512xf32>
      %c0_12 = arith.constant 0 : index
      %c0_13 = arith.constant 0 : index
      %13 = vector.load %arg4[%c0_12, %c0_13] : memref<8x1xf32, #tpu.memory_space<vmem>>, vector<8x1xf32>
      %14 = vector.broadcast %13 : vector<8x1xf32> to vector<8x512xf32>
      %15 = arith.addf %12, %14 : vector<8x512xf32>
      %cst_14 = arith.constant 2.000000e-01 : f32
      %16 = vector.broadcast %cst_14 : f32 to vector<8x512xf32>
      %17 = arith.mulf %16, %15 : vector<8x512xf32>
      %18 = arith.maximumf %15, %17 : vector<8x512xf32>
      %19 = arith.truncf %18 : vector<8x512xf32> to vector<8x512xbf16>
      %c0_15 = arith.constant 0 : index
      %c0_16 = arith.constant 0 : index
      %20 = vector.load %arg5[%c0_15, %c0_16] : memref<8x512xbf16, #tpu.memory_space<vmem>>, vector<8x512xbf16>
      tpu.vector_store %arg5[%c0_15, %c0_16], %19 {strides = array<i32>} : memref<8x512xbf16, #tpu.memory_space<vmem>>, vector<8x512xbf16>,
    } else {
    }
    return
  }
  func.func @transform_0(%arg0: i32, %arg1: i32) -> (i32, i32) {
    %c0_i32 = arith.constant 0 : i32
    %c0_i32_0 = arith.constant 0 : i32
    return %c0_i32, %arg1 : i32, i32
  }
  func.func @transform_1(%arg0: i32, %arg1: i32) -> (i32, i32) {
    %c0_i32 = arith.constant 0 : i32
    return %arg1, %arg0 : i32, i32
  }
  func.func @transform_2(%arg0: i32, %arg1: i32) -> (i32, i32) {
    %c0_i32 = arith.constant 0 : i32
    %c0_i32_0 = arith.constant 0 : i32
    %c0_i32_1 = arith.constant 0 : i32
    return %c0_i32, %c0_i32_0 : i32, i32
  }
  func.func @transform_3(%arg0: i32, %arg1: i32) -> (i32, i32) {
    %c0_i32 = arith.constant 0 : i32
    %c0_i32_0 = arith.constant 0 : i32
    return %c0_i32, %arg0 : i32, i32
  }
}

module attributes {stable_mosaic.version = 11 : i64} {
  func.func @_gemm_bias_act_kernel(%arg0: i32, %arg1: i32, %arg2: memref<16x128xbf16, #tpu.memory_space<vmem>>, %arg3: memref<128x512xbf16, #tpu.memory_space<vmem>>, %arg4: memref<16x1xf32, #tpu.memory_space<vmem>>, %arg5: memref<16x512xbf16, #tpu.memory_space<vmem>>, %arg6: memref<16x512xf32, #tpu.memory_space<vmem>>) attributes {dimension_semantics = [#tpu.dimension_semantics<parallel>, #tpu.dimension_semantics<arbitrary>], iteration_bounds = array<i64: 1, 1>, scalar_prefetch = 0 : i64, scratch_operands = 1 : i64, tpu.core_type = #tpu.core_type<tc>, window_params = [{transform_indices = @transform_0, window_bounds = array<i64: 16, 128>}, {transform_indices = @transform_1, window_bounds = array<i64: 128, 512>}, {pipeline_mode = #tpu.pipeline_mode<synchronous>, transform_indices = @transform_2, window_bounds = array<i64: 16, 1>}, {transform_indices = @transform_3, window_bounds = array<i64: 16, 512>}]} {
    %c0_i32 = arith.constant 0 : i32
    %0 = arith.cmpi eq, %arg1, %c0_i32 : i32
    %1 = arith.extui %0 : i1 to i32
    %c0_i32_0 = arith.constant 0 : i32
    %2 = arith.cmpi ne, %1, %c0_i32_0 : i32
    scf.if %2 {
      %cst_10 = arith.constant 0.000000e+00 : f32
      %12 = vector.broadcast %cst_10 : f32 to vector<16x512xf32>
      %c0_11 = arith.constant 0 : index
      %c0_12 = arith.constant 0 : index
      %13 = vector.load %arg6[%c0_11, %c0_12] : memref<16x512xf32, #tpu.memory_space<vmem>>, vector<16x512xf32>
      tpu.vector_store %arg6[%c0_11, %c0_12], %12 {strides = array<i32>} : memref<16x512xf32, #tpu.memory_space<vmem>>, vector<16x512xf32>,
    } else {
    }
    %c0 = arith.constant 0 : index
    %c0_1 = arith.constant 0 : index
    %3 = vector.load %arg6[%c0, %c0_1] : memref<16x512xf32, #tpu.memory_space<vmem>>, vector<16x512xf32>
    %c0_2 = arith.constant 0 : index
    %c0_3 = arith.constant 0 : index
    %4 = vector.load %arg2[%c0_2, %c0_3] : memref<16x128xbf16, #tpu.memory_space<vmem>>, vector<16x128xbf16>
    %c0_4 = arith.constant 0 : index
    %c0_5 = arith.constant 0 : index
    %5 = vector.load %arg3[%c0_4, %c0_5] : memref<128x512xbf16, #tpu.memory_space<vmem>>, vector<128x512xbf16>
    %cst = arith.constant dense<0.000000e+00> : vector<16x512xf32>
    %6 = tpu.matmul %4, %5, %cst {dimension_numbers = #tpu.dot_dimension_numbers<[1], [0], [0], [1], [0, 0, 1, 1], [], []>} : vector<16x128xbf16>, vector<128x512xbf16>, vector<16x512xf32> -> vector<16x512xf32>
    %7 = arith.addf %3, %6 : vector<16x512xf32>
    %c0_6 = arith.constant 0 : index
    %c0_7 = arith.constant 0 : index
    %8 = vector.load %arg6[%c0_6, %c0_7] : memref<16x512xf32, #tpu.memory_space<vmem>>, vector<16x512xf32>
    tpu.vector_store %arg6[%c0_6, %c0_7], %7 {strides = array<i32>} : memref<16x512xf32, #tpu.memory_space<vmem>>, vector<16x512xf32>,
    %c0_i32_8 = arith.constant 0 : i32
    %9 = arith.cmpi eq, %arg1, %c0_i32_8 : i32
    %10 = arith.extui %9 : i1 to i32
    %c0_i32_9 = arith.constant 0 : i32
    %11 = arith.cmpi ne, %10, %c0_i32_9 : i32
    scf.if %11 {
      %c0_10 = arith.constant 0 : index
      %c0_11 = arith.constant 0 : index
      %12 = vector.load %arg6[%c0_10, %c0_11] : memref<16x512xf32, #tpu.memory_space<vmem>>, vector<16x512xf32>
      %c0_12 = arith.constant 0 : index
      %c0_13 = arith.constant 0 : index
      %13 = vector.load %arg4[%c0_12, %c0_13] : memref<16x1xf32, #tpu.memory_space<vmem>>, vector<16x1xf32>
      %14 = vector.broadcast %13 : vector<16x1xf32> to vector<16x512xf32>
      %15 = arith.addf %12, %14 : vector<16x512xf32>
      %cst_14 = arith.constant 2.000000e-01 : f32
      %16 = vector.broadcast %cst_14 : f32 to vector<16x512xf32>
      %17 = arith.mulf %16, %15 : vector<16x512xf32>
      %18 = arith.maximumf %15, %17 : vector<16x512xf32>
      %19 = arith.truncf %18 : vector<16x512xf32> to vector<16x512xbf16>
      %c0_15 = arith.constant 0 : index
      %c0_16 = arith.constant 0 : index
      %20 = vector.load %arg5[%c0_15, %c0_16] : memref<16x512xbf16, #tpu.memory_space<vmem>>, vector<16x512xbf16>
      tpu.vector_store %arg5[%c0_15, %c0_16], %19 {strides = array<i32>} : memref<16x512xbf16, #tpu.memory_space<vmem>>, vector<16x512xbf16>,
    } else {
    }
    return
  }
  func.func @transform_0(%arg0: i32, %arg1: i32) -> (i32, i32) {
    %c0_i32 = arith.constant 0 : i32
    %c0_i32_0 = arith.constant 0 : i32
    return %c0_i32, %arg1 : i32, i32
  }
  func.func @transform_1(%arg0: i32, %arg1: i32) -> (i32, i32) {
    %c0_i32 = arith.constant 0 : i32
    return %arg1, %arg0 : i32, i32
  }
  func.func @transform_2(%arg0: i32, %arg1: i32) -> (i32, i32) {
    %c0_i32 = arith.constant 0 : i32
    %c0_i32_0 = arith.constant 0 : i32
    %c0_i32_1 = arith.constant 0 : i32
    return %c0_i32, %c0_i32_0 : i32, i32
  }
  func.func @transform_3(%arg0: i32, %arg1: i32) -> (i32, i32) {
    %c0_i32 = arith.constant 0 : i32
    %c0_i32_0 = arith.constant 0 : i32
    return %c0_i32, %arg0 : i32, i32
  }
}

</mosaic_0001>

<bundles_post_ra>
// kernel: critic_sn_forward.3
= control target key start
LH: loop header
LB: loop body
LE: loop exit
PB: predicated region body
PF: predicated region fallthrough
CT: control target
= control target key end

     0   :  { %s1467_s12 = smov 0   ;;  %s1469_s13 = smov 0   ;;  %s1741_s0 = inlined_call_operand.vmem [shape: bf16[4,48], index: 0, kind: input, shape index: {}]   ;;  %s1742_s1 = inlined_call_operand.vmem [shape: bf16[48,8192], index: 1, kind: input, shape index: {}]   ;;  %s1743_s2 = inlined_call_operand.vmem [shape: f32[4,1], index: 2, kind: input, shape index: {}]   ;;  %s1744_s3 = inlined_call_operand.vmem [shape: bf16[4,8192], index: 3, kind: output, shape index: {}]  }
   0x1   :  { %s1471_s14 = smov 0   ;;  %s1473_s15 = smov 0  }
   0x2   :  { %s1475_s16 = smov 0  }
   0x3 LB: > { %s25_s17 = sadd.s32 1, %s1438_s15  ;;  %p67_p1 = scmp.ne.s32.totalorder %s1430_s13, %s1426_s12  ;;  %s1442_s16 = sphi %s1475_s16, %s13_s16   ;;  %s1438_s15 = sphi %s1473_s15, %s1748_s15   ;;  %s1434_s14 = sphi %s1471_s14, %s1747_s14   ;;  %s1430_s13 = sphi %s1469_s13, %s1746_s13   ;;  %s1426_s12 = sphi %s1467_s12, %s1745_s12  }
   0x4   : > { %p27_p0 = scmp.ge.s32.totalorder %s25_s17, 4  ;;  %p68_p2 = scmp.eq.s32.totalorder %s1442_s16, 0 }
   0x5   : > { %s60_s19 = sadd.s32 1, %s1430_s13  ;;  %p1285_p5 = scmp.ge.s32.totalorder %s1442_s16, 4 }
   0x6   : > { %s1750_s17 = smov (%p27_p0, %s25_s17), 0  ;;  %p69_p3 = por %p68_p2, %p67_p1 }
   0x7   : > { %s56_s18 = ssub.s32 %s1438_s15, %s1750_s17  ;;  %150 = sbr.rel (%p1285_p5) target bundleno = 41 (0x29), region = 24 }
   0x8   : > { %p58_p4 = scmp.eq.s32.totalorder %s56_s18, 0 }
   0xa   : > { %s1502_s20 = scalar_select %p58_p4, %s1430_s13, %s60_s19  }
   0xc   : > { %153 = sbr.rel (!%p69_p3) target bundleno = 41 (0x29), region = 28  ;;  %s155_s21 = sand.u32 (%p69_p3), 1, %s1430_s13  }
   0xd   : > { %s1357_s22 = sshll.u32 (%p69_p3), %s1438_s15, 6  ;;  %s1358_s23 = smul.u32 (%p69_p3), 384, %s155_s21 }
   0xe   : > { %s1510_s26 = scalar_lea.vmem (%p69_p3), %s1742_s1, %s1357_s22 }
   0xf   : > { %v176_v0 = vld [vmem:[%s1510_s26] sm:$0xff] (%p69_p3)  ;;  %v178_v1 = vld [vmem:[%s1510_s26 + $0x8] sm:$0xff] (%p69_p3)  ;;  %v180_v2 = vld [vmem:[%s1510_s26 + $0x10] sm:$0xff] (%p69_p3)  ;;  %s1518_s27 = scalar_lea.vmem (%p69_p3), [#allocation3], %s1358_s23 }
  0x10   : > { %v182_v3 = vld [vmem:[%s1510_s26 + $0x18] sm:$0xff] (%p69_p3)  ;;  %v184_v4 = vld [vmem:[%s1510_s26 + $0x20] sm:$0xff] (%p69_p3)  ;;  %v186_v5 = vld [vmem:[%s1510_s26 + $0x28] sm:$0xff] (%p69_p3)  ;;  %177 = vst [vmem:[%s1518_s27] sm:$0xff] (%p69_p3), %v176_v0 }
  0x11   : > { %179 = vst [vmem:[%s1518_s27 + $0x8] sm:$0xff] %v178_v1  ;;  %181 = vst [vmem:[%s1518_s27 + $0x10] sm:$0xff] %v180_v2  ;;  %v188_v6 = vld [vmem:[%s1510_s26 + $0x30] sm:$0xff]  ;;  %v190_v7 = vld [vmem:[%s1510_s26 + $0x38] sm:$0xff] }
  0x12   : > { %183 = vst [vmem:[%s1518_s27 + $0x18] sm:$0xff] %v182_v3  ;;  %185 = vst [vmem:[%s1518_s27 + $0x20] sm:$0xff] %v184_v4  ;;  %v192_v8 = vld [vmem:[%s1510_s26 + $0x100] sm:$0xff]  ;;  %v194_v9 = vld [vmem:[%s1510_s26 + $0x108] sm:$0xff] }
  0x13   : > { %187 = vst [vmem:[%s1518_s27 + $0x28] sm:$0xff] %v186_v5  ;;  %189 = vst [vmem:[%s1518_s27 + $0x30] sm:$0xff] %v188_v6  ;;  %v196_v10 = vld [vmem:[%s1510_s26 + $0x110] sm:$0xff]  ;;  %v198_v11 = vld [vmem:[%s1510_s26 + $0x118] sm:$0xff] }
  0x14   : > { %191 = vst [vmem:[%s1518_s27 + $0x38] sm:$0xff] %v190_v7  ;;  %193 = vst [vmem:[%s1518_s27 + $0x40] sm:$0xff] %v192_v8  ;;  %v200_v12 = vld [vmem:[%s1510_s26 + $0x120] sm:$0xff]  ;;  %v202_v13 = vld [vmem:[%s1510_s26 + $0x128] sm:$0xff] }
  0x15   : > { %195 = vst [vmem:[%s1518_s27 + $0x48] sm:$0xff] %v194_v9  ;;  %197 = vst [vmem:[%s1518_s27 + $0x50] sm:$0xff] %v196_v10  ;;  %v204_v14 = vld [vmem:[%s1510_s26 + $0x130] sm:$0xff]  ;;  %v206_v15 = vld [vmem:[%s1510_s26 + $0x138] sm:$0xff] }
  0x16   : > { %199 = vst [vmem:[%s1518_s27 + $0x58] sm:$0xff] %v198_v11  ;;  %201 = vst [vmem:[%s1518_s27 + $0x60] sm:$0xff] %v200_v12  ;;  %v208_v16 = vld [vmem:[%s1510_s26 + $0x200] sm:$0xff]  ;;  %v210_v17 = vld [vmem:[%s1510_s26 + $0x208] sm:$0xff] }
  0x17   : > { %203 = vst [vmem:[%s1518_s27 + $0x68] sm:$0xff] %v202_v13  ;;  %205 = vst [vmem:[%s1518_s27 + $0x70] sm:$0xff] %v204_v14  ;;  %v212_v18 = vld [vmem:[%s1510_s26 + $0x210] sm:$0xff]  ;;  %v214_v19 = vld [vmem:[%s1510_s26 + $0x218] sm:$0xff] }
  0x18   : > { %207 = vst [vmem:[%s1518_s27 + $0x78] sm:$0xff] %v206_v15  ;;  %209 = vst [vmem:[%s1518_s27 + $0x80] sm:$0xff] %v208_v16  ;;  %v216_v20 = vld [vmem:[%s1510_s26 + $0x220] sm:$0xff]  ;;  %v218_v21 = vld [vmem:[%s1510_s26 + $0x228] sm:$0xff] }
  0x19   : > { %211 = vst [vmem:[%s1518_s27 + $0x88] sm:$0xff] %v210_v17  ;;  %213 = vst [vmem:[%s1518_s27 + $0x90] sm:$0xff] %v212_v18  ;;  %v220_v22 = vld [vmem:[%s1510_s26 + $0x230] sm:$0xff]  ;;  %v222_v23 = vld [vmem:[%s1510_s26 + $0x238] sm:$0xff] }
  0x1a   : > { %215 = vst [vmem:[%s1518_s27 + $0x98] sm:$0xff] %v214_v19  ;;  %217 = vst [vmem:[%s1518_s27 + $0xa0] sm:$0xff] %v216_v20  ;;  %v224_v24 = vld [vmem:[%s1510_s26 + $0x300] sm:$0xff]  ;;  %v226_v25 = vld [vmem:[%s1510_s26 + $0x308] sm:$0xff] }
  0x1b   : > { %219 = vst [vmem:[%s1518_s27 + $0xa8] sm:$0xff] %v218_v21  ;;  %221 = vst [vmem:[%s1518_s27 + $0xb0] sm:$0xff] %v220_v22  ;;  %v228_v26 = vld [vmem:[%s1510_s26 + $0x310] sm:$0xff]  ;;  %v230_v27 = vld [vmem:[%s1510_s26 + $0x318] sm:$0xff] }
  0x1c   : > { %223 = vst [vmem:[%s1518_s27 + $0xb8] sm:$0xff] %v222_v23  ;;  %225 = vst [vmem:[%s1518_s27 + $0xc0] sm:$0xff] %v224_v24  ;;  %v232_v28 = vld [vmem:[%s1510_s26 + $0x320] sm:$0xff]  ;;  %v234_v29 = vld [vmem:[%s1510_s26 + $0x328] sm:$0xff] }
  0x1d   : > { %227 = vst [vmem:[%s1518_s27 + $0xc8] sm:$0xff] %v226_v25  ;;  %229 = vst [vmem:[%s1518_s27 + $0xd0] sm:$0xff] %v228_v26  ;;  %v236_v30 = vld [vmem:[%s1510_s26 + $0x330] sm:$0xff]  ;;  %v238_v31 = vld [vmem:[%s1510_s26 + $0x338] sm:$0xff] }
  0x1e   : > { %231 = vst [vmem:[%s1518_s27 + $0xd8] sm:$0xff] %v230_v27  ;;  %233 = vst [vmem:[%s1518_s27 + $0xe0] sm:$0xff] %v232_v28  ;;  %v240_v32 = vld [vmem:[%s1510_s26 + $0x400] sm:$0xff]  ;;  %v242_v33 = vld [vmem:[%s1510_s26 + $0x408] sm:$0xff] }
  0x1f   : > { %235 = vst [vmem:[%s1518_s27 + $0xe8] sm:$0xff] %v234_v29  ;;  %237 = vst [vmem:[%s1518_s27 + $0xf0] sm:$0xff] %v236_v30  ;;  %v244_v34 = vld [vmem:[%s1510_s26 + $0x410] sm:$0xff]  ;;  %v246_v35 = vld [vmem:[%s1510_s26 + $0x418] sm:$0xff] }
  0x20   : > { %239 = vst [vmem:[%s1518_s27 + $0xf8] sm:$0xff] %v238_v31  ;;  %241 = vst [vmem:[%s1518_s27 + $0x100] sm:$0xff] %v240_v32  ;;  %v248_v36 = vld [vmem:[%s1510_s26 + $0x420] sm:$0xff]  ;;  %v250_v37 = vld [vmem:[%s1510_s26 + $0x428] sm:$0xff] }
  0x21   : > { %243 = vst [vmem:[%s1518_s27 + $0x108] sm:$0xff] %v242_v33  ;;  %245 = vst [vmem:[%s1518_s27 + $0x110] sm:$0xff] %v244_v34  ;;  %v252_v38 = vld [vmem:[%s1510_s26 + $0x430] sm:$0xff]  ;;  %v254_v39 = vld [vmem:[%s1510_s26 + $0x438] sm:$0xff] }
  0x22   : > { %247 = vst [vmem:[%s1518_s27 + $0x118] sm:$0xff] %v246_v35  ;;  %249 = vst [vmem:[%s1518_s27 + $0x120] sm:$0xff] %v248_v36  ;;  %v256_v40 = vld [vmem:[%s1510_s26 + $0x500] sm:$0xff]  ;;  %v258_v41 = vld [vmem:[%s1510_s26 + $0x508] sm:$0xff] }
  0x23   : > { %251 = vst [vmem:[%s1518_s27 + $0x128] sm:$0xff] %v250_v37  ;;  %253 = vst [vmem:[%s1518_s27 + $0x130] sm:$0xff] %v252_v38  ;;  %v260_v42 = vld [vmem:[%s1510_s26 + $0x510] sm:$0xff]  ;;  %v262_v43 = vld [vmem:[%s1510_s26 + $0x518] sm:$0xff] }
  0x24   : > { %255 = vst [vmem:[%s1518_s27 + $0x138] sm:$0xff] %v254_v39  ;;  %257 = vst [vmem:[%s1518_s27 + $0x140] sm:$0xff] %v256_v40  ;;  %v264_v44 = vld [vmem:[%s1510_s26 + $0x520] sm:$0xff]  ;;  %v266_v45 = vld [vmem:[%s1510_s26 + $0x528] sm:$0xff] }
  0x25   : > { %259 = vst [vmem:[%s1518_s27 + $0x148] sm:$0xff] %v258_v41  ;;  %261 = vst [vmem:[%s1518_s27 + $0x150] sm:$0xff] %v260_v42  ;;  %v268_v46 = vld [vmem:[%s1510_s26 + $0x530] sm:$0xff]  ;;  %v270_v47 = vld [vmem:[%s1510_s26 + $0x538] sm:$0xff] }
  0x26   : > { %263 = vst [vmem:[%s1518_s27 + $0x158] sm:$0xff] %v262_v43  ;;  %265 = vst [vmem:[%s1518_s27 + $0x160] sm:$0xff] %v264_v44 }
  0x27   : > { %267 = vst [vmem:[%s1518_s27 + $0x168] sm:$0xff] %v266_v45  ;;  %269 = vst [vmem:[%s1518_s27 + $0x170] sm:$0xff] %v268_v46 }
  0x28   : > { %271 = vst [vmem:[%s1518_s27 + $0x178] sm:$0xff] %v270_v47 }
  0x29 PF: > { %p1288_p6 = scmp.ge.s32.totalorder %s1442_s16, 1  ;;  %p276_p7 = scmp.lt.s32.totalorder %s1442_s16, 5 }
  0x2b   : > { %p277_p8 = pnand %p1288_p6, %p276_p7 }
  0x2c   : > { %s283_s28 = sand.u32 (!%p277_p8), 1, %s1426_s12   ;;  %s1289_s8 = sshll.u32 (!%p277_p8), %s1434_s14, 4 }
  0x2d   : > { %280 = sbr.rel (%p277_p8) target bundleno = 315 (0x13b), region = 51  ;;  %p317_p9 = scmp.lt.s32.totalorder (!%p277_p8), %s1289_s8, 63 }
  0x2e   : > { %s1359_s29 = smul.u32 (!%p277_p8), 384, %s283_s28 }
  0x30   : > { %s1619_s5 = scalar_lea.vmem (!%p277_p8), [#allocation3], %s1359_s29 }
  0x32   : > { %v1444_v48 = vmov 0   ;;  %v1023_v49 = vld [vmem:[%s1743_s2] sm:$0xf]  ;;  %v377_v52 = vld [vmem:[%s1619_s5 + $0x108] sm:$0xff]  ;;  %v378_v8 = vld [vmem:[%s1619_s5 + $0x110] sm:$0xff]  ;;  %vm632_vm0 = vcmask 392192  }
  0x33   : > { %668 = vmatprep.mubr.bf16.mxu0 %v1444_v48  ;;  %709 = vmatprep.mubr.bf16.mxu1 %v1444_v48  ;;  %v376_v50 = vld [vmem:[%s1619_s5 + $0x100] sm:$0xff]  ;;  %v385_v54 = vld [vmem:[%s1619_s5 + $0x148] sm:$0xff]  ;;  %v386_v9 = vld [vmem:[%s1619_s5 + $0x150] sm:$0xff]  ;;  %s1752_s8 = smov (!%p317_p9, %s1289_s8), 63 }
  0x34   : > { %1403 = vset.pattern.permute.xlu0 %v1444_v48  ;;  %v384_v51 = vld [vmem:[%s1619_s5 + $0x140] sm:$0xff]  ;;  %v1326_v58 = vcombine.high %v377_v52, %v385_v54  ;;  %v1325_v59 = vcombine.low %v377_v52, %v385_v54  ;;  %v361_v61 = vld [vmem:[%s1619_s5 + $0x88] sm:$0xff]  ;;  %v379_v10 = vld [vmem:[%s1619_s5 + $0x118] sm:$0xff]  ;;  %v1328_v14 = vcombine.high %v378_v8, %v386_v9  ;;  %v1327_v21 = vcombine.low %v378_v8, %v386_v9  ;;  %s1290_s9 = sshll.u32 %s1752_s8, 1 }
  0x35   : > { %1026 = vperm.xlu0 %1403, %v1023_v49   ;;  %v1324_v53 = vcombine.high %v376_v50, %v384_v51  ;;  %v1323_v55 = vcombine.low %v376_v50, %v384_v51  ;;  %v360_v56 = vld [vmem:[%s1619_s5 + $0x80] sm:$0xff]  ;;  %v369_v62 = vld [vmem:[%s1619_s5 + $0xc8] sm:$0xff]  ;;  %v387_v11 = vld [vmem:[%s1619_s5 + $0x158] sm:$0xff]  ;;  %s1708_s12 = scalar_lea.vmem %s1744_s3, %s1290_s9 }
  0x36   : > { %v368_v57 = vld [vmem:[%s1619_s5 + $0xc0] sm:$0xff]  ;;  %v1310_v0 = vcombine.high %v361_v61, %v369_v62  ;;  %v345_v2 = vld [vmem:[%s1619_s5 + $0x8] sm:$0xff]  ;;  %687 = vmatprep.subr.bf16.mxu1 %v1326_v58  ;;  %v1309_v5 = vcombine.low %v361_v61, %v369_v62  ;;  %v1330_v15 = vcombine.high %v379_v10, %v387_v11  ;;  %v362_v16 = vld [vmem:[%s1619_s5 + $0x90] sm:$0xff]  ;;  %v1329_v22 = vcombine.low %v379_v10, %v387_v11 }
  0x37   : > { %v1308_v60 = vcombine.high %v360_v56, %v368_v57  ;;  %v344_v63 = vld [vmem:[%s1619_s5] sm:$0xff]  ;;  %646 = vmatprep.subr.bf16.mxu0 %v1324_v53  ;;  %v353_v3 = vld [vmem:[%s1619_s5 + $0x48] sm:$0xff]  ;;  %v1307_v4 = vcombine.low %v360_v56, %v368_v57  ;;  %688 = vmatpush1.bf16.msra.mxu1 %v1325_v59  ;;  %v370_v17 = vld [vmem:[%s1619_s5 + $0xd0] sm:$0xff] }
  0x38   : > { %v352_v1 = vld [vmem:[%s1619_s5 + $0x40] sm:$0xff]  ;;  %647 = vmatpush1.bf16.msra.mxu0 %v1323_v55  ;;  %689 = vmatprep.subr.bf16.mxu1 %v1310_v0  ;;  %v1294_v7 = vcombine.high %v345_v2, %v353_v3  ;;  %v1293_v13 = vcombine.low %v345_v2, %v353_v3  ;;  %v363_v18 = vld [vmem:[%s1619_s5 + $0x98] sm:$0xff]  ;;  %v1312_v23 = vcombine.high %v362_v16, %v370_v17  ;;  %v346_v25 = vld [vmem:[%s1619_s5 + $0x10] sm:$0xff] }
  0x39   : > { %648 = vmatprep.subr.bf16.mxu0 %v1308_v60  ;;  %v1292_v6 = vcombine.high %v344_v63, %v352_v1  ;;  %v1291_v12 = vcombine.low %v344_v63, %v352_v1  ;;  %v371_v19 = vld [vmem:[%s1619_s5 + $0xd8] sm:$0xff]  ;;  %v1644_v20 = vld [vmem:[%s1741_s0] sm:$0x3]  ;;  %v354_v26 = vld [vmem:[%s1619_s5 + $0x50] sm:$0xff]  ;;  %v1311_v29 = vcombine.low %v362_v16, %v370_v17 }
  0x3a   : > { %v1314_v24 = vcombine.high %v363_v18, %v371_v19  ;;  %v347_v27 = vld [vmem:[%s1619_s5 + $0x18] sm:$0xff]  ;;  %v1313_v30 = vcombine.low %v363_v18, %v371_v19  ;;  %v1296_v31 = vcombine.high %v346_v25, %v354_v26  ;;  %v380_v33 = vld [vmem:[%s1619_s5 + $0x120] sm:$0xff]  ;;  %v381_v35 = vld [vmem:[%s1619_s5 + $0x128] sm:$0xff]  ;;  %v1295_v37 = vcombine.low %v346_v25, %v354_v26 }
  0x3b   : > { %690 = vmatpush1.bf16.msra.mxu1 %v1309_v5  ;;  %v355_v28 = vld [vmem:[%s1619_s5 + $0x58] sm:$0xff]  ;;  %v388_v34 = vld [vmem:[%s1619_s5 + $0x160] sm:$0xff]  ;;  %v389_v36 = vld [vmem:[%s1619_s5 + $0x168] sm:$0xff] }
  0x3c   : > { %649 = vmatpush1.bf16.msra.mxu0 %v1307_v4  ;;  %691 = vmatprep.subr.bf16.mxu1 %v1294_v7  ;;  %v1298_v32 = vcombine.high %v347_v27, %v355_v28  ;;  %v1297_v38 = vcombine.low %v347_v27, %v355_v28  ;;  %v1332_v39 = vcombine.high %v380_v33, %v388_v34  ;;  %v364_v41 = vld [vmem:[%s1619_s5 + $0xa0] sm:$0xff]  ;;  %v365_v43 = vld [vmem:[%s1619_s5 + $0xa8] sm:$0xff]  ;;  %v382_v58 = vld [vmem:[%s1619_s5 + $0x130] sm:$0xff] }
  0x3d   : > { %650 = vmatprep.subr.bf16.mxu0 %v1292_v6  ;;  %v1334_v40 = vcombine.high %v381_v35, %v389_v36  ;;  %v372_v42 = vld [vmem:[%s1619_s5 + $0xe0] sm:$0xff]  ;;  %v373_v44 = vld [vmem:[%s1619_s5 + $0xe8] sm:$0xff]  ;;  %v1331_v45 = vcombine.low %v380_v33, %v388_v34  ;;  %v1333_v46 = vcombine.low %v381_v35, %v389_v36  ;;  %v390_v59 = vld [vmem:[%s1619_s5 + $0x170] sm:$0xff] }
  0x3e   : > { %v1316_v47 = vcombine.high %v364_v41, %v372_v42  ;;  %v1318_v49 = vcombine.high %v365_v43, %v373_v44  ;;  %v348_v50 = vld [vmem:[%s1619_s5 + $0x20] sm:$0xff]  ;;  %v349_v52 = vld [vmem:[%s1619_s5 + $0x28] sm:$0xff]  ;;  %v1315_v54 = vcombine.low %v364_v41, %v372_v42  ;;  %v1317_v55 = vcombine.low %v365_v43, %v373_v44  ;;  %v383_v60 = vld [vmem:[%s1619_s5 + $0x138] sm:$0xff] }
  0x3f   : > { %692 = vmatpush1.bf16.msra.mxu1 %v1293_v13  ;;  %v356_v51 = vld [vmem:[%s1619_s5 + $0x60] sm:$0xff]  ;;  %v357_v53 = vld [vmem:[%s1619_s5 + $0x68] sm:$0xff]  ;;  %v391_v61 = vld [vmem:[%s1619_s5 + $0x178] sm:$0xff]  ;;  %v1336_v0 = vcombine.high %v382_v58, %v390_v59  ;;  %v1335_v6 = vcombine.low %v382_v58, %v390_v59 }
  0x40   : > { %651 = vmatpush1.bf16.msra.mxu0 %v1291_v12  ;;  %769 = vmatprep.subr.bf16.mxu1 %v1330_v15  ;;  %v1300_v56 = vcombine.high %v348_v50, %v356_v51  ;;  %v1302_v57 = vcombine.high %v349_v52, %v357_v53  ;;  %v1299_v62 = vcombine.low %v348_v50, %v356_v51  ;;  %v366_v2 = vld [vmem:[%s1619_s5 + $0xb0] sm:$0xff]  ;;  %v367_v4 = vld [vmem:[%s1619_s5 + $0xb8] sm:$0xff] }
  0x41   : > { %728 = vmatprep.subr.bf16.mxu0 %v1328_v14  ;;  %v1301_v63 = vcombine.low %v349_v52, %v357_v53  ;;  %v1338_v1 = vcombine.high %v383_v60, %v391_v61  ;;  %v374_v3 = vld [vmem:[%s1619_s5 + $0xf0] sm:$0xff]  ;;  %v375_v5 = vld [vmem:[%s1619_s5 + $0xf8] sm:$0xff]  ;;  %v1337_v7 = vcombine.low %v383_v60, %v391_v61 }
  0x42   : > { %1340 = vmatmul.mubr.msk.bf16.vlgmr.msra.gmra.mxu1 %vm632_vm0, %v1644_v20  ;;  %v1320_v8 = vcombine.high %v366_v2, %v374_v3  ;;  %v1322_v9 = vcombine.high %v367_v4, %v375_v5  ;;  %v350_v10 = vld [vmem:[%s1619_s5 + $0x30] sm:$0xff]  ;;  %v351_v12 = vld [vmem:[%s1619_s5 + $0x38] sm:$0xff]  ;;  %v1319_v14 = vcombine.low %v366_v2, %v374_v3  ;;  %v1321_v15 = vcombine.low %v367_v4, %v375_v5 }
  0x43   : > { %1339 = vmatmul.mubr.msk.bf16.vlgmr.msra.gmra.mxu0 %vm632_vm0, %v1644_v20  ;;  %770 = vmatpush1.bf16.msra.mxu1 %v1329_v22  ;;  %v358_v11 = vld [vmem:[%s1619_s5 + $0x70] sm:$0xff]  ;;  %v359_v13 = vld [vmem:[%s1619_s5 + $0x78] sm:$0xff] }
  0x44   : > { %729 = vmatpush1.bf16.msra.mxu0 %v1327_v21  ;;  %771 = vmatprep.subr.bf16.mxu1 %v1314_v24  ;;  %v1304_v16 = vcombine.high %v350_v10, %v358_v11  ;;  %v1306_v17 = vcombine.high %v351_v12, %v359_v13  ;;  %v1303_v18 = vcombine.low %v350_v10, %v358_v11  ;;  %v1445_v21 = vmov 839922192  }
  0x45   : > { %730 = vmatprep.subr.bf16.mxu0 %v1312_v23  ;;  %750 = vmatprep.mubr.bf16.mxu0 %v1444_v48  ;;  %v1305_v19 = vcombine.low %v351_v12, %v359_v13  ;;  %v1029_v22 = vunpack.c.l.s4 %v1445_v21  ;;  %v1031_v23 = vlaneseq }
  0x46   : > { %791 = vmatprep.mubr.bf16.mxu1 %v1444_v48 }
  0x47   : > { %772 = vmatpush1.bf16.msra.mxu1 %v1313_v30  ;;  %v1030_v24 = vunpack.c.0.s8 %v1029_v22 }
  0x48   : > { %731 = vmatpush1.bf16.msra.mxu0 %v1311_v29  ;;  %773 = vmatprep.subr.bf16.mxu1 %v1298_v32 }
  0x49   : > { %732 = vmatprep.subr.bf16.mxu0 %v1296_v31  ;;  %v1446_v31 = vmov 1983009808  }
  0x4a   : > { %v1119_v32 = vunpack.c.l.s4 %v1446_v31 }
  0x4b   : > { %774 = vmatpush1.bf16.msra.mxu1 %v1297_v38 }
  0x4c   : > { %733 = vmatpush1.bf16.msra.mxu0 %v1295_v37  ;;  %851 = vmatprep.subr.bf16.mxu1 %v1334_v40  ;;  %v1120_v40 = vunpack.c.0.s8 %v1119_v32 }
  0x4d   : > { %810 = vmatprep.subr.bf16.mxu0 %v1332_v39 }
  0x4e   : > { %1342 = vmatmul.mubr.msk.bf16.vlgmr.msra.gmra.mxu1 %vm632_vm0, %v1644_v20 }
  0x4f   : > { %1341 = vmatmul.mubr.msk.bf16.vlgmr.msra.gmra.mxu0 %vm632_vm0, %v1644_v20  ;;  %852 = vmatpush1.bf16.msra.mxu1 %v1333_v46 }
  0x50   : > { %811 = vmatpush1.bf16.msra.mxu0 %v1331_v45  ;;  %853 = vmatprep.subr.bf16.mxu1 %v1318_v49 }
  0x51   : > { %812 = vmatprep.subr.bf16.mxu0 %v1316_v47  ;;  %832 = vmatprep.mubr.bf16.mxu0 %v1444_v48 }
  0x52   : > { %873 = vmatprep.mubr.bf16.mxu1 %v1444_v48 }
  0x53   : > { %854 = vmatpush1.bf16.msra.mxu1 %v1317_v55 }
  0x54   : > { %813 = vmatpush1.bf16.msra.mxu0 %v1315_v54  ;;  %855 = vmatprep.subr.bf16.mxu1 %v1302_v57 }
  0x55   : > { %814 = vmatprep.subr.bf16.mxu0 %v1300_v56 }
  0x57   : > { %856 = vmatpush1.bf16.msra.mxu1 %v1301_v63 }
  0x58   : > { %815 = vmatpush1.bf16.msra.mxu0 %v1299_v62  ;;  %933 = vmatprep.subr.bf16.mxu1 %v1338_v1 }
  0x59   : > { %892 = vmatprep.subr.bf16.mxu0 %v1336_v0 }
  0x5a   : > { %1344 = vmatmul.mubr.msk.bf16.vlgmr.msra.gmra.mxu1 %vm632_vm0, %v1644_v20 }
  0x5b   : > { %1343 = vmatmul.mubr.msk.bf16.vlgmr.msra.gmra.mxu0 %vm632_vm0, %v1644_v20  ;;  %934 = vmatpush1.bf16.msra.mxu1 %v1337_v7 }
  0x5c   : > { %893 = vmatpush1.bf16.msra.mxu0 %v1335_v6  ;;  %935 = vmatprep.subr.bf16.mxu1 %v1322_v9 }
  0x5d   : > { %894 = vmatprep.subr.bf16.mxu0 %v1320_v8  ;;  %914 = vmatprep.mubr.bf16.mxu0 %v1444_v48 }
  0x5e   : > { %955 = vmatprep.mubr.bf16.mxu1 %v1444_v48  ;;  %v1032_v48 = vshrl.u32 %v1031_v23, 7 }
  0x5f   : > { %936 = vmatpush1.bf16.msra.mxu1 %v1321_v15 }
  0x60   : > { %895 = vmatpush1.bf16.msra.mxu0 %v1319_v14  ;;  %937 = vmatprep.subr.bf16.mxu1 %v1306_v17  ;;  %v1033_v25 = vsub.s32 %v1030_v24, %v1032_v48  ;;  %v1701_v46 = vsub.s32 %v1120_v40, %v1032_v48 }
  0x61   : > { %896 = vmatprep.subr.bf16.mxu0 %v1304_v16 }
  0x63   : > { %938 = vmatpush1.bf16.msra.mxu1 %v1305_v19 }
  0x64   : > { %897 = vmatpush1.bf16.msra.mxu0 %v1303_v18 }
  0x66   : > { %1346 = vmatmul.mubr.msk.bf16.vlgmr.msra.gmra.mxu1 %vm632_vm0, %v1644_v20 }
  0x67   : > { %1345 = vmatmul.mubr.msk.bf16.vlgmr.msra.gmra.mxu0 %vm632_vm0, %v1644_v20 }
  0xb0   : > { %v1027_v26 = vpop.permute.xlu0 %1026 }
  0xb1   : > { %v1696_v29 = vrot.slane %v1027_v26, %v1033_v25 }
 0x102   : > { %v711_v28 = vpop.f32.mrf.mxu1 }
 0x103   : > { %v670_v27 = vpop.f32.mrf.mxu0 }
 0x104   : > { %v713_v34 = vpop.f32.mrf.mxu1 }
 0x105   : > { %v672_v30 = vpop.f32.mrf.mxu0  ;;  %v981_v35 = vcombine.low %v711_v28, %v713_v34 }
 0x106   : > { %v980_v33 = vcombine.low %v670_v27, %v672_v30  ;;  %v715_v37 = vpop.f32.mrf.mxu1 }
 0x107   : > { %v674_v36 = vpop.f32.mrf.mxu0  ;;  %v1037_v38 = vadd.f32 %v1696_v29, %v981_v35 }
 0x108   : > { %v1036_v20 = vadd.f32 %v1696_v29, %v980_v33  ;;  %v716_v42 = vpop.f32.mrf.mxu1 }
 0x109   : > { %v675_v39 = vpop.f32.mrf.mxu0  ;;  %v1045_v43 = vmul.f32 0.2, %v1037_v38 }
 0x10a   : > { %v1044_v41 = vmul.f32 0.2, %v1036_v20 }
 0x10b   : > { %v1053_v45 = vmax.f32 %v1037_v38, %v1045_v43 }
 0x10c   : > { %v1052_v44 = vmax.f32 %v1036_v20, %v1044_v41 }
 0x10d   : > { %v1069_v49 = vcombine.high %v1053_v45, %v1053_v45 }
 0x10e   : > { %v1068_v47 = vcombine.high %v1052_v44, %v1052_v44  ;;  %v793_v52 = vpop.f32.mrf.mxu1 }
 0x10f   : > { %v752_v50 = vpop.f32.mrf.mxu0  ;;  %v1348_v53 = vpack.c.bf16 %v1069_v49, %v1053_v45 }
 0x110   : > { %v1347_v51 = vpack.c.bf16 %v1068_v47, %v1052_v44  ;;  %v795_v57 = vpop.f32.mrf.mxu1 }
 0x111   : > { %v754_v54 = vpop.f32.mrf.mxu0  ;;  %v1131_v58 = vrot.slane %v1348_v53, %v1701_v46  ;;  %v983_v59 = vcombine.low %v793_v52, %v795_v57 }
 0x112   : > { %v1124_v55 = vrot.slane %v1347_v51, %v1701_v46  ;;  %v982_v56 = vcombine.low %v752_v50, %v754_v54  ;;  %v797_v62 = vpop.f32.mrf.mxu1 }
 0x113   : > { %v756_v60 = vpop.f32.mrf.mxu0  ;;  %v1039_v0 = vadd.f32 %v1696_v29, %v983_v59 }
 0x114   : > { %v1038_v61 = vadd.f32 %v1696_v29, %v982_v56  ;;  %v1132_v63 = vcombine.low %v1124_v55, %v1131_v58  ;;  %v798_v3 = vpop.f32.mrf.mxu1 }
 0x115   : > { %v757_v1 = vpop.f32.mrf.mxu0  ;;  %v1047_v4 = vmul.f32 0.2, %v1039_v0 }
 0x116   : > { %v1046_v2 = vmul.f32 0.2, %v1038_v61  ;;  %1188 = vst [vmem:[%s1708_s12] sm:$0xff] %v1132_v63 }
 0x117   : > { %v1055_v6 = vmax.f32 %v1039_v0, %v1047_v4 }
 0x118   : > { %v1054_v5 = vmax.f32 %v1038_v61, %v1046_v2 }
 0x119   : > { %v1071_v8 = vcombine.high %v1055_v6, %v1055_v6 }
 0x11a   : > { %v1070_v7 = vcombine.high %v1054_v5, %v1054_v5  ;;  %v875_v11 = vpop.f32.mrf.mxu1 }
 0x11b   : > { %v834_v9 = vpop.f32.mrf.mxu0  ;;  %v1350_v12 = vpack.c.bf16 %v1071_v8, %v1055_v6 }
 0x11c   : > { %v1349_v10 = vpack.c.bf16 %v1070_v7, %v1054_v5  ;;  %v877_v16 = vpop.f32.mrf.mxu1 }
 0x11d   : > { %v836_v13 = vpop.f32.mrf.mxu0  ;;  %v1148_v17 = vrot.slane %v1350_v12, %v1701_v46  ;;  %v985_v18 = vcombine.low %v875_v11, %v877_v16 }
 0x11e   : > { %v1141_v14 = vrot.slane %v1349_v10, %v1701_v46  ;;  %v984_v15 = vcombine.low %v834_v9, %v836_v13  ;;  %v879_v22 = vpop.f32.mrf.mxu1 }
 0x11f   : > { %v838_v19 = vpop.f32.mrf.mxu0  ;;  %v1041_v24 = vadd.f32 %v1696_v29, %v985_v18 }
 0x120   : > { %v1040_v21 = vadd.f32 %v1696_v29, %v984_v15  ;;  %v1149_v23 = vcombine.low %v1141_v14, %v1148_v17  ;;  %v880_v26 = vpop.f32.mrf.mxu1 }
 0x121   : > { %v839_v48 = vpop.f32.mrf.mxu0  ;;  %v1049_v27 = vmul.f32 0.2, %v1041_v24 }
 0x122   : > { %v1048_v25 = vmul.f32 0.2, %v1040_v21  ;;  %1189 = vst [vmem:[%s1708_s12 + $0x8] sm:$0xff] %v1149_v23 }
 0x123   : > { %v1057_v30 = vmax.f32 %v1041_v24, %v1049_v27 }
 0x124   : > { %v1056_v28 = vmax.f32 %v1040_v21, %v1048_v25 }
 0x125   : > { %v1073_v32 = vcombine.high %v1057_v30, %v1057_v30 }
 0x126   : > { %v1072_v31 = vcombine.high %v1056_v28, %v1056_v28  ;;  %v957_v35 = vpop.f32.mrf.mxu1 }
 0x127   : > { %v916_v33 = vpop.f32.mrf.mxu0  ;;  %v1352_v36 = vpack.c.bf16 %v1073_v32, %v1057_v30 }
 0x128   : > { %v1351_v34 = vpack.c.bf16 %v1072_v31, %v1056_v28  ;;  %v959_v39 = vpop.f32.mrf.mxu1 }
 0x129   : > { %v918_v20 = vpop.f32.mrf.mxu0  ;;  %v1165_v40 = vrot.slane %v1352_v36, %v1701_v46  ;;  %v987_v41 = vcombine.low %v957_v35, %v959_v39 }
 0x12a   : > { %v1158_v37 = vrot.slane %v1351_v34, %v1701_v46  ;;  %v986_v38 = vcombine.low %v916_v33, %v918_v20  ;;  %v961_v44 = vpop.f32.mrf.mxu1 }
 0x12b   : > { %v920_v42 = vpop.f32.mrf.mxu0  ;;  %v1043_v47 = vadd.f32 %v1696_v29, %v987_v41 }
 0x12c   : > { %v1042_v43 = vadd.f32 %v1696_v29, %v986_v38  ;;  %v1166_v45 = vcombine.low %v1158_v37, %v1165_v40  ;;  %v962_v51 = vpop.f32.mrf.mxu1 }
 0x12d   : > { %v921_v49 = vpop.f32.mrf.mxu0  ;;  %v1051_v52 = vmul.f32 0.2, %v1043_v47 }
 0x12e   : > { %v1050_v50 = vmul.f32 0.2, %v1042_v43  ;;  %1190 = vst [vmem:[%s1708_s12 + $0x10] sm:$0xff] %v1166_v45 }
 0x12f   : > { %v1059_v54 = vmax.f32 %v1043_v47, %v1051_v52 }
 0x130   : > { %v1058_v53 = vmax.f32 %v1042_v43, %v1050_v50 }
 0x131   : > { %v1075_v56 = vcombine.high %v1059_v54, %v1059_v54 }
 0x132   : > { %v1074_v55 = vcombine.high %v1058_v53, %v1058_v53 }
 0x133   : > { %v1354_v58 = vpack.c.bf16 %v1075_v56, %v1059_v54 }
 0x134   : > { %v1353_v57 = vpack.c.bf16 %v1074_v55, %v1058_v53 }
 0x135   : > { %v1182_v60 = vrot.slane %v1354_v58, %v1701_v46 }
 0x136   : > { %v1175_v59 = vrot.slane %v1353_v57, %v1701_v46 }
 0x138   : > { %v1183_v61 = vcombine.low %v1175_v59, %v1182_v60 }
 0x13a   : > { %1191 = vst [vmem:[%s1708_s12 + $0x18] sm:$0xff] %v1183_v61 }
 0x13b PF: > { %s13_s16 = sadd.s32 1, %s1442_s16   ;;  %s1745_s12 = smov %s1430_s13 }
 0x13c   : > { %p10_p10 = scmp.ge.s32.totalorder %s13_s16, 6   ;;  %s1746_s13 = smov %s1502_s20 }
 0x13d   : > { %s1747_s14 = smov %s1438_s15  ;;  %s1748_s15 = smov %s1750_s17 }
 0x13e   :  { %12 = sbr.rel (!%p10_p10) target bundleno = 3 (0x3), region = 101 }

// kernel: critic_sn_forward.4
= control target key start
LH: loop header
LB: loop body
LE: loop exit
PB: predicated region body
PF: predicated region fallthrough
CT: control target
= control target key end

     0   :  { %s758_s12 = smov 0   ;;  %s760_s13 = smov 0   ;;  %s847_s0 = inlined_call_operand.vmem [shape: bf16[8,64], index: 0, kind: input, shape index: {}]   ;;  %s848_s1 = inlined_call_operand.vmem [shape: bf16[64,2048], index: 1, kind: input, shape index: {}]   ;;  %s849_s2 = inlined_call_operand.vmem [shape: f32[8,1], index: 2, kind: input, shape index: {}]   ;;  %s850_s3 = inlined_call_operand.vmem [shape: bf16[8,2048], index: 3, kind: output, shape index: {}]  }
   0x1   :  { %s762_s14 = smov 0   ;;  %s764_s15 = smov 0  }
   0x2   :  { %s766_s16 = smov 0  }
   0x3 LB: > { %s25_s17 = sadd.s32 1, %s731_s15  ;;  %p67_p1 = scmp.ne.s32.totalorder %s723_s13, %s719_s12  ;;  %s735_s16 = sphi %s766_s16, %s13_s16   ;;  %s731_s15 = sphi %s764_s15, %s854_s15   ;;  %s727_s14 = sphi %s762_s14, %s853_s14   ;;  %s723_s13 = sphi %s760_s13, %s852_s13   ;;  %s719_s12 = sphi %s758_s12, %s851_s12  }
   0x4   : > { %p27_p0 = scmp.ge.s32.totalorder %s25_s17, 4  ;;  %p68_p2 = scmp.eq.s32.totalorder %s735_s16, 0 }
   0x5   : > { %s60_s19 = sadd.s32 1, %s723_s13  ;;  %p598_p5 = scmp.ge.s32.totalorder %s735_s16, 4 }
   0x6   : > { %s856_s17 = smov (%p27_p0, %s25_s17), 0  ;;  %p69_p3 = por %p68_p2, %p67_p1 }
   0x7   : > { %s56_s18 = ssub.s32 %s731_s15, %s856_s17  ;;  %150 = sbr.rel (%p598_p5) target bundleno = 24 (0x18), region = 24 }
   0x8   : > { %p58_p4 = scmp.eq.s32.totalorder %s56_s18, 0 }
   0xa   : > { %s793_s20 = scalar_select %p58_p4, %s723_s13, %s60_s19  }
   0xc   : > { %153 = sbr.rel (!%p69_p3) target bundleno = 24 (0x18), region = 28  ;;  %s155_s21 = sand.u32 (%p69_p3), 1, %s723_s13  }
   0xd   : > { %s628_s22 = sshll.u32 (%p69_p3), %s731_s15, 4  ;;  %s599_s23 = sshll.u32 (%p69_p3), %s155_s21, 7 }
   0xe   : > { %s801_s26 = scalar_lea.vmem (%p69_p3), %s848_s1, %s628_s22  ;;  %s157_s27 = scalar_lea.vmem (%p69_p3), [#allocation3], %s599_s23 }
   0xf   : > { %v176_v0 = vld [vmem:[%s801_s26] sm:$0xff] (%p69_p3)  ;;  %v178_v1 = vld [vmem:[%s801_s26 + $0x8] sm:$0xff] (%p69_p3) }
  0x10   : > { %v180_v2 = vld [vmem:[%s801_s26 + $0x40] sm:$0xff] (%p69_p3)  ;;  %177 = vst [vmem:[%s157_s27] sm:$0xff] (%p69_p3), %v176_v0  ;;  %179 = vst [vmem:[%s157_s27 + $0x8] sm:$0xff] (%p69_p3), %v178_v1  ;;  %v182_v3 = vld [vmem:[%s801_s26 + $0x48] sm:$0xff] (%p69_p3) }
  0x11   : > { %181 = vst [vmem:[%s157_s27 + $0x10] sm:$0xff] %v180_v2  ;;  %v184_v4 = vld [vmem:[%s801_s26 + $0x80] sm:$0xff]  ;;  %v186_v5 = vld [vmem:[%s801_s26 + $0x88] sm:$0xff]  ;;  %183 = vst [vmem:[%s157_s27 + $0x18] sm:$0xff] %v182_v3 }
  0x12   : > { %185 = vst [vmem:[%s157_s27 + $0x20] sm:$0xff] %v184_v4  ;;  %187 = vst [vmem:[%s157_s27 + $0x28] sm:$0xff] %v186_v5  ;;  %v188_v6 = vld [vmem:[%s801_s26 + $0xc0] sm:$0xff]  ;;  %v190_v7 = vld [vmem:[%s801_s26 + $0xc8] sm:$0xff] }
  0x13   : > { %v192_v8 = vld [vmem:[%s801_s26 + $0x100] sm:$0xff]  ;;  %189 = vst [vmem:[%s157_s27 + $0x30] sm:$0xff] %v188_v6  ;;  %191 = vst [vmem:[%s157_s27 + $0x38] sm:$0xff] %v190_v7  ;;  %v194_v9 = vld [vmem:[%s801_s26 + $0x108] sm:$0xff] }
  0x14   : > { %193 = vst [vmem:[%s157_s27 + $0x40] sm:$0xff] %v192_v8  ;;  %v196_v10 = vld [vmem:[%s801_s26 + $0x140] sm:$0xff]  ;;  %v198_v11 = vld [vmem:[%s801_s26 + $0x148] sm:$0xff]  ;;  %195 = vst [vmem:[%s157_s27 + $0x48] sm:$0xff] %v194_v9 }
  0x15   : > { %197 = vst [vmem:[%s157_s27 + $0x50] sm:$0xff] %v196_v10  ;;  %199 = vst [vmem:[%s157_s27 + $0x58] sm:$0xff] %v198_v11  ;;  %v200_v12 = vld [vmem:[%s801_s26 + $0x180] sm:$0xff]  ;;  %v202_v13 = vld [vmem:[%s801_s26 + $0x188] sm:$0xff] }
  0x16   : > { %v204_v14 = vld [vmem:[%s801_s26 + $0x1c0] sm:$0xff]  ;;  %201 = vst [vmem:[%s157_s27 + $0x60] sm:$0xff] %v200_v12  ;;  %203 = vst [vmem:[%s157_s27 + $0x68] sm:$0xff] %v202_v13  ;;  %v206_v15 = vld [vmem:[%s801_s26 + $0x1c8] sm:$0xff] }
  0x17   : > { %205 = vst [vmem:[%s157_s27 + $0x70] sm:$0xff] %v204_v14  ;;  %207 = vst [vmem:[%s157_s27 + $0x78] sm:$0xff] %v206_v15 }
  0x18 PF: > { %p602_p6 = scmp.ge.s32.totalorder %s735_s16, 1  ;;  %p212_p7 = scmp.lt.s32.totalorder %s735_s16, 5 }
  0x1a   : > { %p213_p8 = pnand %p602_p6, %p212_p7 }
  0x1b   : > { %s219_s28 = sand.u32 (!%p213_p8), 1, %s719_s12   ;;  %s604_s8 = sshll.u32 (!%p213_p8), %s727_s14, 2 }
  0x1c   : > { %216 = sbr.rel (%p213_p8) target bundleno = 256 (0x100), region = 51  ;;  %s603_s4 = sshll.u32 (!%p213_p8), %s219_s28, 7 }
  0x1d   : > { %s221_s5 = scalar_lea.vmem (!%p213_p8), [#allocation3], %s603_s4  ;;  %p253_p9 = scmp.lt.s32.totalorder (!%p213_p8), %s604_s8, 15 }
  0x21   : > { %v469_v16 = vld [vmem:[%s849_s2] sm:$0xff]  ;;  %v737_v17 = vmov 0   ;;  %v675_v19 = vld [vmem:[%s221_s5 + $0x6c] ss:$16 sps:$4 sm:$0xff]   ;;  %v678_v21 = vld [vmem:[%s221_s5 + $0x68] ss:$16 sps:$4 sm:$0xff]  }
  0x22   : > { %404 = vmatprep.mubr.bf16.mxu0 %v737_v17  ;;  %445 = vmatprep.mubr.bf16.mxu1 %v737_v17  ;;  %v673_v18 = vld [vmem:[%s221_s5 + $0x64] ss:$16 sps:$4 sm:$0xff]   ;;  %v677_v20 = vld [vmem:[%s221_s5 + $0x60] ss:$16 sps:$4 sm:$0xff]   ;;  %v681_v23 = vld [vmem:[%s221_s5 + $0x4c] ss:$16 sps:$4 sm:$0xff]  }
  0x23   : > { %672 = vset.pattern.permute.xlu0 %v737_v17  ;;  %380 = vmatprep.subr.bf16.mxu0 %v673_v18  ;;  %v679_v22 = vld [vmem:[%s221_s5 + $0x44] ss:$16 sps:$4 sm:$0xff]   ;;  %v683_v24 = vld [vmem:[%s221_s5 + $0x40] ss:$16 sps:$4 sm:$0xff]   ;;  %v684_v25 = vld [vmem:[%s221_s5 + $0x48] ss:$16 sps:$4 sm:$0xff]  }
  0x24   : > { %472 = vperm.xlu0 %672, %v469_v16   ;;  %421 = vmatprep.subr.bf16.mxu1 %v675_v19  ;;  %v685_v26 = vld [vmem:[%s221_s5 + $0x24] ss:$16 sps:$4 sm:$0xff]   ;;  %v687_v27 = vld [vmem:[%s221_s5 + $0x2c] ss:$16 sps:$4 sm:$0xff]   ;;  %v689_v28 = vld [vmem:[%s221_s5 + $0x20] ss:$16 sps:$4 sm:$0xff]  }
  0x25   : > { %381 = vmatpush1.bf16.msra.mxu0 %v677_v20  ;;  %422 = vmatpush1.bf16.msra.mxu1 %v678_v21  ;;  %v690_v29 = vld [vmem:[%s221_s5 + $0x28] ss:$16 sps:$4 sm:$0xff]   ;;  %v691_v30 = vld [vmem:[%s221_s5 + $0x4] ss:$16 sps:$4 sm:$0xff]   ;;  %v693_v31 = vld [vmem:[%s221_s5 + $0xc] ss:$16 sps:$4 sm:$0xff]  }
  0x26   : > { %382 = vmatprep.subr.bf16.mxu0 %v679_v22  ;;  %423 = vmatprep.subr.bf16.mxu1 %v681_v23  ;;  %v695_v32 = vld [vmem:[%s221_s5] ss:$16 sps:$4 sm:$0xff]   ;;  %v696_v33 = vld [vmem:[%s221_s5 + $0x8] ss:$16 sps:$4 sm:$0xff]   ;;  %vm368_vm0 = vcmask 523264   ;;  %s858_s8 = smov (!%p253_p9, %s604_s8), 15 }
  0x27   : > { %v271_v34 = vld [vmem:[%s847_s0] sm:$0xf]  ;;  %s605_s9 = sshll.u32 %s858_s8, 2 }
  0x28   : > { %s256_s12 = scalar_lea.vmem %s850_s3, %s605_s9 }
  0x29   : > { %383 = vmatpush1.bf16.msra.mxu0 %v683_v24  ;;  %424 = vmatpush1.bf16.msra.mxu1 %v684_v25 }
  0x2a   : > { %384 = vmatprep.subr.bf16.mxu0 %v685_v26  ;;  %425 = vmatprep.subr.bf16.mxu1 %v687_v27 }
  0x2d   : > { %385 = vmatpush1.bf16.msra.mxu0 %v689_v28  ;;  %426 = vmatpush1.bf16.msra.mxu1 %v690_v29 }
  0x2e   : > { %386 = vmatprep.subr.bf16.mxu0 %v691_v30  ;;  %427 = vmatprep.subr.bf16.mxu1 %v693_v31 }
  0x31   : > { %387 = vmatpush1.bf16.msra.mxu0 %v695_v32  ;;  %428 = vmatpush1.bf16.msra.mxu1 %v696_v33 }
  0x34   : > { %622 = vmatmul.mubr.msk.bf16.vlgmr.msra.gmra.mxu0 %vm368_vm0, %v271_v34  ;;  %623 = vmatmul.mubr.msk.bf16.vlgmr.msra.gmra.mxu1 %vm368_vm0, %v271_v34 }
  0x9f   : > { %v473_v35 = vpop.permute.xlu0 %472 }
  0xf4   : > { %v406_v36 = vpop.f32.mrf.mxu0  ;;  %v447_v37 = vpop.f32.mrf.mxu1 }
  0xf5   : > { %v475_v38 = vadd.f32 %v473_v35, %v406_v36  ;;  %v477_v39 = vadd.f32 %v473_v35, %v447_v37 }
  0xf6   : > { %v408_v40 = vpop.f32.mrf.mxu0  ;;  %v449_v41 = vpop.f32.mrf.mxu1 }
  0xf7   : > { %v479_v42 = vmul.f32 0.2, %v475_v38  ;;  %v481_v43 = vmul.f32 0.2, %v477_v39  ;;  %v476_v44 = vadd.f32 %v473_v35, %v408_v40  ;;  %v478_v45 = vadd.f32 %v473_v35, %v449_v41 }
  0xf8   : > { %v410_v46 = vpop.f32.mrf.mxu0  ;;  %v451_v47 = vpop.f32.mrf.mxu1 }
  0xf9   : > { %v480_v48 = vmul.f32 0.2, %v476_v44  ;;  %v482_v49 = vmul.f32 0.2, %v478_v45  ;;  %v483_v52 = vmax.f32 %v475_v38, %v479_v42  ;;  %v485_v53 = vmax.f32 %v477_v39, %v481_v43 }
  0xfa   : > { %v411_v50 = vpop.f32.mrf.mxu0  ;;  %v452_v51 = vpop.f32.mrf.mxu1 }
  0xfb   : > { %v484_v54 = vmax.f32 %v476_v44, %v480_v48  ;;  %v486_v55 = vmax.f32 %v478_v45, %v482_v49 }
  0xfd   : > { %v629_v56 = vpack.c.bf16 %v484_v54, %v483_v52  ;;  %v630_v57 = vpack.c.bf16 %v486_v55, %v485_v53 }
  0xff   : > { %503 = vst [vmem:[%s256_s12] sm:$0xff] %v629_v56  ;;  %504 = vst [vmem:[%s256_s12 + $0x8] sm:$0xff] %v630_v57 }
 0x100 PF: > { %s13_s16 = sadd.s32 1, %s735_s16   ;;  %s851_s12 = smov %s723_s13 }
 0x101   : > { %p10_p10 = scmp.ge.s32.totalorder %s13_s16, 6   ;;  %s852_s13 = smov %s793_s20 }
 0x102   : > { %s853_s14 = smov %s731_s15  ;;  %s854_s15 = smov %s856_s17 }
 0x103   :  { %12 = sbr.rel (!%p10_p10) target bundleno = 3 (0x3), region = 101 }

// kernel: critic_sn_forward.5
= control target key start
LH: loop header
LB: loop body
LE: loop exit
PB: predicated region body
PF: predicated region fallthrough
CT: control target
= control target key end

     0   :  { %v508_v1 = vmov 0   ;;  %s646_s1 = inlined_call_operand.vmem [shape: bf16[128,512], index: 1, kind: input, shape index: {}]   ;;  %s647_s2 = inlined_call_operand.vmem [shape: f32[16,1], index: 2, kind: input, shape index: {}]   ;;  %s648_s0 = inlined_call_operand.vmem [shape: bf16[16,128], index: 0, kind: input, shape index: {}]   ;;  %s649_s3 = inlined_call_operand.vmem [shape: bf16[16,512], index: 3, kind: output, shape index: {}]  }
   0x1   :  { %v459_v0 = vld [vmem:[%s646_s1 + $0xe4] ss:$16 sps:$4 sm:$0xff]   ;;  %267 = vmatprep.mubr.bf16.mxu0 %v508_v1  ;;  %310 = vmatprep.mubr.bf16.mxu1 %v508_v1  ;;  %v461_v2 = vld [vmem:[%s646_s1 + $0xec] ss:$16 sps:$4 sm:$0xff]   ;;  %v463_v3 = vld [vmem:[%s646_s1 + $0xe0] ss:$16 sps:$4 sm:$0xff]  }
   0x2   :  { %458 = vset.pattern.permute.xlu0 %v508_v1  ;;  %235 = vmatprep.subr.bf16.mxu0 %v459_v0  ;;  %v464_v4 = vld [vmem:[%s646_s1 + $0xe8] ss:$16 sps:$4 sm:$0xff]   ;;  %v465_v5 = vld [vmem:[%s646_s1 + $0xc4] ss:$16 sps:$4 sm:$0xff]   ;;  %v467_v6 = vld [vmem:[%s646_s1 + $0xcc] ss:$16 sps:$4 sm:$0xff]  }
   0x3   :  { %278 = vmatprep.subr.bf16.mxu1 %v461_v2  ;;  %236 = vmatpush1.bf16.msra.mxu0 %v463_v3  ;;  %v469_v7 = vld [vmem:[%s646_s1 + $0xc0] ss:$16 sps:$4 sm:$0xff]   ;;  %v470_v8 = vld [vmem:[%s646_s1 + $0xc8] ss:$16 sps:$4 sm:$0xff]   ;;  %v471_v9 = vld [vmem:[%s646_s1 + $0xa4] ss:$16 sps:$4 sm:$0xff]  }
   0x4   :  { %279 = vmatpush1.bf16.msra.mxu1 %v464_v4  ;;  %237 = vmatprep.subr.bf16.mxu0 %v465_v5  ;;  %v473_v10 = vld [vmem:[%s646_s1 + $0xac] ss:$16 sps:$4 sm:$0xff]   ;;  %v475_v11 = vld [vmem:[%s646_s1 + $0xa0] ss:$16 sps:$4 sm:$0xff]   ;;  %v476_v12 = vld [vmem:[%s646_s1 + $0xa8] ss:$16 sps:$4 sm:$0xff]  }
   0x5   :  { %280 = vmatprep.subr.bf16.mxu1 %v467_v6  ;;  %v477_v13 = vld [vmem:[%s646_s1 + $0x84] ss:$16 sps:$4 sm:$0xff]   ;;  %v479_v14 = vld [vmem:[%s646_s1 + $0x8c] ss:$16 sps:$4 sm:$0xff]   ;;  %v481_v15 = vld [vmem:[%s646_s1 + $0x80] ss:$16 sps:$4 sm:$0xff]  }
   0x6   :  { %v482_v16 = vld [vmem:[%s646_s1 + $0x88] ss:$16 sps:$4 sm:$0xff]   ;;  %v483_v17 = vld [vmem:[%s646_s1 + $0x64] ss:$16 sps:$4 sm:$0xff]   ;;  %v485_v18 = vld [vmem:[%s646_s1 + $0x6c] ss:$16 sps:$4 sm:$0xff]  }
   0x7   :  { %238 = vmatpush1.bf16.msra.mxu0 %v469_v7  ;;  %v487_v19 = vld [vmem:[%s646_s1 + $0x60] ss:$16 sps:$4 sm:$0xff]   ;;  %v488_v20 = vld [vmem:[%s646_s1 + $0x68] ss:$16 sps:$4 sm:$0xff]   ;;  %v489_v21 = vld [vmem:[%s646_s1 + $0x44] ss:$16 sps:$4 sm:$0xff]  }
   0x8   :  { %281 = vmatpush1.bf16.msra.mxu1 %v470_v8  ;;  %239 = vmatprep.subr.bf16.mxu0 %v471_v9  ;;  %v491_v22 = vld [vmem:[%s646_s1 + $0x4c] ss:$16 sps:$4 sm:$0xff]   ;;  %v493_v23 = vld [vmem:[%s646_s1 + $0x40] ss:$16 sps:$4 sm:$0xff]   ;;  %v494_v24 = vld [vmem:[%s646_s1 + $0x48] ss:$16 sps:$4 sm:$0xff]  }
   0x9   :  { %282 = vmatprep.subr.bf16.mxu1 %v473_v10  ;;  %v495_v25 = vld [vmem:[%s646_s1 + $0x24] ss:$16 sps:$4 sm:$0xff]   ;;  %v497_v26 = vld [vmem:[%s646_s1 + $0x2c] ss:$16 sps:$4 sm:$0xff]   ;;  %v499_v28 = vld [vmem:[%s646_s1 + $0x20] ss:$16 sps:$4 sm:$0xff]  }
   0xa   :  { %v348_v27 = vld [vmem:[%s647_s2] sm:$0xff]  ;;  %v500_v29 = vld [vmem:[%s646_s1 + $0x28] ss:$16 sps:$4 sm:$0xff]   ;;  %v503_v32 = vld [vmem:[%s646_s1 + $0xc] ss:$16 sps:$4 sm:$0xff]  }
   0xb   :  { %240 = vmatpush1.bf16.msra.mxu0 %v475_v11  ;;  %352 = vperm.xlu0 %458, %v348_v27   ;;  %v349_v30 = vld [vmem:[%s647_s2 + $0x8] sm:$0xff]  ;;  %v501_v31 = vld [vmem:[%s646_s1 + $0x4] ss:$16 sps:$4 sm:$0xff]   ;;  %v505_v33 = vld [vmem:[%s646_s1] ss:$16 sps:$4 sm:$0xff]  }
   0xc   :  { %283 = vmatpush1.bf16.msra.mxu1 %v476_v12  ;;  %241 = vmatprep.subr.bf16.mxu0 %v477_v13  ;;  %v506_v34 = vld [vmem:[%s646_s1 + $0x8] ss:$16 sps:$4 sm:$0xff]   ;;  %v507_v35 = vld [vmem:[%s648_s0] sm:$0xff]  }
   0xd   :  { %284 = vmatprep.subr.bf16.mxu1 %v479_v14 }
   0xf   :  { %242 = vmatpush1.bf16.msra.mxu0 %v481_v15  ;;  %357 = vperm.xlu0 %458, %v349_v30  }
  0x10   :  { %285 = vmatpush1.bf16.msra.mxu1 %v482_v16  ;;  %243 = vmatprep.subr.bf16.mxu0 %v483_v17 }
  0x11   :  { %286 = vmatprep.subr.bf16.mxu1 %v485_v18 }
  0x13   :  { %244 = vmatpush1.bf16.msra.mxu0 %v487_v19 }
  0x14   :  { %287 = vmatpush1.bf16.msra.mxu1 %v488_v20  ;;  %245 = vmatprep.subr.bf16.mxu0 %v489_v21 }
  0x15   :  { %288 = vmatprep.subr.bf16.mxu1 %v491_v22 }
  0x17   :  { %246 = vmatpush1.bf16.msra.mxu0 %v493_v23 }
  0x18   :  { %289 = vmatpush1.bf16.msra.mxu1 %v494_v24  ;;  %247 = vmatprep.subr.bf16.mxu0 %v495_v25 }
  0x19   :  { %290 = vmatprep.subr.bf16.mxu1 %v497_v26 }
  0x1b   :  { %248 = vmatpush1.bf16.msra.mxu0 %v499_v28 }
  0x1c   :  { %291 = vmatpush1.bf16.msra.mxu1 %v500_v29  ;;  %249 = vmatprep.subr.bf16.mxu0 %v501_v31 }
  0x1d   :  { %292 = vmatprep.subr.bf16.mxu1 %v503_v32 }
  0x1f   :  { %250 = vmatpush1.bf16.msra.mxu0 %v505_v33 }
  0x20   :  { %293 = vmatpush1.bf16.msra.mxu1 %v506_v34 }
  0x22   :  { %268 = vmatmul.mubr.bf16.vlgmr.msra.gmra.mxu0 %v507_v35 }
  0x23   :  { %311 = vmatmul.mubr.bf16.vlgmr.msra.gmra.mxu1 %v507_v35 }
  0x86   :  { %v353_v36 = vpop.permute.xlu0 %352 }
  0x8a   :  { %v358_v49 = vpop.permute.xlu0 %357 }
  0xe2   :  { %v269_v37 = vpop.f32.mrf.mxu0 }
  0xe3   :  { %v312_v38 = vpop.f32.mrf.mxu1  ;;  %v360_v39 = vadd.f32 %v353_v36, %v269_v37 }
  0xe4   :  { %v362_v40 = vadd.f32 %v353_v36, %v312_v38  ;;  %v271_v41 = vpop.f32.mrf.mxu0 }
  0xe5   :  { %v314_v42 = vpop.f32.mrf.mxu1  ;;  %v368_v43 = vmul.f32 0.2, %v360_v39  ;;  %v361_v45 = vadd.f32 %v353_v36, %v271_v41 }
  0xe6   :  { %v370_v44 = vmul.f32 0.2, %v362_v40  ;;  %v363_v46 = vadd.f32 %v353_v36, %v314_v42  ;;  %v273_v47 = vpop.f32.mrf.mxu0 }
  0xe7   :  { %v316_v48 = vpop.f32.mrf.mxu1  ;;  %v369_v50 = vmul.f32 0.2, %v361_v45  ;;  %v376_v52 = vmax.f32 %v360_v39, %v368_v43  ;;  %v364_v54 = vadd.f32 %v358_v49, %v273_v47 }
  0xe8   :  { %v371_v51 = vmul.f32 0.2, %v363_v46  ;;  %v378_v53 = vmax.f32 %v362_v40, %v370_v44  ;;  %v366_v55 = vadd.f32 %v358_v49, %v316_v48  ;;  %v275_v56 = vpop.f32.mrf.mxu0 }
  0xe9   :  { %v318_v57 = vpop.f32.mrf.mxu1  ;;  %v377_v58 = vmax.f32 %v361_v45, %v369_v50  ;;  %v365_v60 = vadd.f32 %v358_v49, %v275_v56  ;;  %v372_v62 = vmul.f32 0.2, %v364_v54 }
  0xea   :  { %v379_v59 = vmax.f32 %v363_v46, %v371_v51  ;;  %v367_v61 = vadd.f32 %v358_v49, %v318_v57  ;;  %v374_v63 = vmul.f32 0.2, %v366_v55 }
  0xeb   :  { %v453_v0 = vpack.c.bf16 %v377_v58, %v376_v52  ;;  %v373_v2 = vmul.f32 0.2, %v365_v60  ;;  %v380_v4 = vmax.f32 %v364_v54, %v372_v62 }
  0xec   :  { %v454_v1 = vpack.c.bf16 %v379_v59, %v378_v53  ;;  %v375_v3 = vmul.f32 0.2, %v367_v61  ;;  %v382_v5 = vmax.f32 %v366_v55, %v374_v63 }
  0xed   :  { %408 = vst [vmem:[%s649_s3] sm:$0xff] %v453_v0  ;;  %v381_v6 = vmax.f32 %v365_v60, %v373_v2 }
  0xee   :  { %409 = vst [vmem:[%s649_s3 + $0x8] sm:$0xff] %v454_v1  ;;  %v383_v7 = vmax.f32 %v367_v61, %v375_v3 }
  0xef   :  { %v455_v8 = vpack.c.bf16 %v381_v6, %v380_v4 }
  0xf0   :  { %v456_v9 = vpack.c.bf16 %v383_v7, %v382_v5 }
  0xf1   :  { %410 = vst [vmem:[%s649_s3 + $0x10] sm:$0xff] %v455_v8 }
  0xf2   :  { %411 = vst [vmem:[%s649_s3 + $0x18] sm:$0xff] %v456_v9 }

</bundles_post_ra>
